<compile_context>
chip_gen: v7x
topology: tpu7x:2x2x1
jax: 0.10.0
libtpu: 0.0.40
codegen_flags: <defaults>
</compile_context>

<pallas_src>
import functools
import math

import jax
import jax.numpy as jnp
from jax import lax
from jax.experimental import pallas as pl
from jax.experimental.pallas import tpu as pltpu


def _mha_decov_kernel(q_ref, k_ref, v_ref, wqkv_ref, bqkv_ref, wo_ref, bo_ref,
                      out_ref, loss_ref, *, B, S, h, d_k):
    D = h * d_k
    BS = B * S
    HB = h * B
    f32 = jnp.float32

    # ---------------- fused Q/K/V projections: three 2-D MXU matmuls --------
    # Weights are pre-transposed wrapper-side (nn.Linear stores (out, in)).
    Q = jnp.dot(q_ref[...], wqkv_ref[0], preferred_element_type=f32) + bqkv_ref[0]
    K = jnp.dot(k_ref[...], wqkv_ref[1], preferred_element_type=f32) + bqkv_ref[1]
    V = jnp.dot(v_ref[...], wqkv_ref[2], preferred_element_type=f32) + bqkv_ref[2]

    # ------------- fold (head, batch) into ONE leading batch axis -----------
    # (B*S, D) -> (B*S, h, d_k) -> (h, B*S, d_k) -> (h*B, S, d_k)
    # Rank-3 transpose keeps the minor (lane) dim fixed; the leading-dim
    # regroup (h, B*S) == (h*B, S) is a free row-major reinterpretation.
    def split_heads(x):
        x = x.reshape(BS, h, d_k)
        x = jnp.transpose(x, (1, 0, 2))          # (h, B*S, d_k)
        return x.reshape(HB, S, d_k)             # (h*B, S, d_k)

    Qh = split_heads(Q)
    Kh = split_heads(K)
    Vh = split_heads(V)

    # ---------------- attention: 2 batched dots over the full (h,B) extent --
    inv_sqrt_dk = 1.0 / math.sqrt(d_k)
    # scores[hb, q, k] = <Qh[hb, q, :], Kh[hb, k, :]> / sqrt(d_k)
    sc = lax.dot_general(Qh, Kh, (((2,), (2,)), ((0,), (0,))),
                         preferred_element_type=f32) * inv_sqrt_dk
    sc = sc - jnp.max(sc, axis=-1, keepdims=True)
    p = jnp.exp(sc)
    p = p / jnp.sum(p, axis=-1, keepdims=True)    # exact softmax (review item)
    # ctx[hb, q, d] = sum_k p[hb, q, k] * Vh[hb, k, d]
    ctx_hb = lax.dot_general(p, Vh, (((2,), (1,)), ((0,), (0,))),
                             preferred_element_type=f32)       # (h*B, S, d_k)

    # ---------------- merge heads once (no lane-axis concatenate) -----------
    # (h*B, S, d_k) -> (h, B*S, d_k) -> (B*S, h, d_k) -> (B*S, D)
    ctx = jnp.transpose(ctx_hb.reshape(h, BS, d_k), (1, 0, 2)).reshape(BS, D)

    # ---------------- final linear (weight pre-transposed) ------------------
    out_ref[...] = (jnp.dot(ctx, wo_ref[...], preferred_element_type=f32)
                    + bo_ref[...])

    # ---------------- fused DeCov loss (ctx never leaves VMEM) --------------
    # For each feature s: cov_s = Xc_s^T Xc_s / (B-1), Xc_s = ctx[:, s, :]
    # centered over the batch.  ||Xc^T Xc||_F^2 == ||Xc Xc^T||_F^2, so we use
    # tiny (B, B) Grams batched over s (one rank-3 leading-batch dot_general).
    ctx3 = ctx.reshape(B, S, D)
    xc = ctx3 - jnp.mean(ctx3, axis=0, keepdims=True)          # (B, S, D)
    xcs = jnp.transpose(xc, (1, 0, 2))                         # (S, B, D)
    g = lax.dot_general(xcs, xcs, (((2,), (2,)), ((0,), (0,))),
                        preferred_element_type=f32)            # (S, B, B)
    sq = jnp.sum(xc * xc, axis=0)                              # (S, D) == (B-1)*diag
    # B == 1 yields inf/nan (division by zero), matching the PyTorch reference.
    inv_bm1_sq = 1.0 / jnp.float32((B - 1) * (B - 1))
    loss_ref[0, 0] = 0.5 * (jnp.sum(g * g) - jnp.sum(sq * sq)) * inv_bm1_sq


@functools.partial(jax.jit, static_argnums=(4,))
def multi_headed_attention(q, k, v, params, h):
    B, S, D = q.shape
    d_k = D // h
    BS = B * S
    wq, bq, wk, bk, wv, bv, wo, bo = params

    # One-time, weight-sized wrapper work (activations are NOT stacked).
    wqkv_t = jnp.stack([wq.T, wk.T, wv.T], axis=0)              # (3, D, D)
    bqkv = jnp.stack([bq, bk, bv], axis=0).reshape(3, 1, D)     # (3, 1, D)
    wo_t = wo.T                                                 # (D, D)
    bo2 = bo.reshape(1, D)                                      # (1, D)

    # Advisory cost hint so XLA schedules around this tiny kernel.
    flops = (2 * 3 * BS * D * D          # Q/K/V projections
             + 4 * B * h * S * S * d_k   # scores + p@V
             + 2 * BS * D * D            # output projection
             + 2 * S * B * B * D)        # DeCov Grams
    bytes_accessed = 4 * (3 * BS * D            # q, k, v
                          + 3 * D * D + 3 * D   # stacked qkv weights/biases
                          + D * D + D           # output weight/bias
                          + BS * D + 1)         # outputs
    cost = pl.CostEstimate(flops=flops,
                           transcendentals=B * h * S * S,       # softmax exps
                           bytes_accessed=bytes_accessed)

    vmem = lambda: pl.BlockSpec(memory_space=pltpu.MemorySpace.VMEM)
    out_flat, loss = pl.pallas_call(
        functools.partial(_mha_decov_kernel, B=B, S=S, h=h, d_k=d_k),
        out_shape=(jax.ShapeDtypeStruct((BS, D), jnp.float32),
                   jax.ShapeDtypeStruct((1, 1), jnp.float32)),
        in_specs=[vmem() for _ in range(7)],
        out_specs=(vmem(),
                   pl.BlockSpec(memory_space=pltpu.MemorySpace.SMEM)),
        compiler_params=pltpu.CompilerParams(vmem_limit_bytes=32 * 1024 * 1024),
        cost_estimate=cost,
    )(q.reshape(BS, D), k.reshape(BS, D), v.reshape(BS, D),
      wqkv_t, bqkv, wo_t, bo2)

    return out_flat.reshape(B, S, D), loss[0, 0]


def _reference(q, k, v, params, h):
    """Pure-JAX reference mirroring the PyTorch forward."""
    wq, bq, wk, bk, wv, bv, wo, bo = params
    B, S, D = q.shape
    d_k = D // h
    lin = lambda x, w, b: x @ w.T + b
    Q = lin(q, wq, bq).reshape(B, S, h, d_k).transpose(0, 2, 1, 3)
    K = lin(k, wk, bk).reshape(B, S, h, d_k).transpose(0, 2, 1, 3)
    V = lin(v, wv, bv).reshape(B, S, h, d_k).transpose(0, 2, 1, 3)
    scores = Q @ jnp.swapaxes(K, -1, -2) / math.sqrt(d_k)
    p = jax.nn.softmax(scores, axis=-1)
    x = (p @ V).transpose(0, 2, 1, 3).reshape(B, S, D)
    dec = x.transpose(1, 2, 0)                 # (S, D, B)
    loss = jnp.float32(0.0)
    for s in range(S):
        m = dec[s]                             # (D, B)
        xc = m - m.mean(axis=1)[:, None]
        cov = xc @ xc.T / (B - 1)
        loss += 0.5 * (jnp.sum(cov ** 2) - jnp.sum(jnp.diag(cov) ** 2))
    return lin(x, wo, bo), loss


if __name__ == "__main__":
    B, S, D, H = 2, 8, 32, 4   # nbatches, feature_dim, d_model, heads
    key = jax.random.PRNGKey(0)
    ks = jax.random.split(key, 12)

    q = jax.random.normal(ks[0], (B, S, D), jnp.float32)
    k = jax.random.normal(ks[1], (B, S, D), jnp.float32)
    v = jax.random.normal(ks[2], (B, S, D), jnp.float32)

    scale = 1.0 / math.sqrt(D)
    params = (
        jax.random.normal(ks[3], (D, D), jnp.float32) * scale,   # W_q
        jax.random.normal(ks[4], (D,), jnp.float32) * scale,     # b_q
        jax.random.normal(ks[5], (D, D), jnp.float32) * scale,   # W_k
        jax.random.normal(ks[6], (D,), jnp.float32) * scale,     # b_k
        jax.random.normal(ks[7], (D, D), jnp.float32) * scale,   # W_v
        jax.random.normal(ks[8], (D,), jnp.float32) * scale,     # b_v
        jax.random.normal(ks[9], (D, D), jnp.float32) * scale,   # W_o
        jax.random.normal(ks[10], (D,), jnp.float32) * scale,    # b_o
    )

    out, decov_loss = multi_headed_attention(q, k, v, params, H)
    jax.block_until_ready(out)
    jax.block_until_ready(decov_loss)

    ref_out, ref_loss = _reference(q, k, v, params, H)
    # Softmax is exact now; the remaining tolerance only buffers default MXU
    # matmul-precision differences between the Mosaic kernel and the XLA
    # reference (structural errors would be O(1)).
    assert jnp.allclose(out, ref_out, rtol=1e-2, atol=1e-2), "output mismatch"
    assert jnp.allclose(decov_loss, ref_loss, rtol=1e-2, atol=1e-2), "DeCov mismatch"

    print("KERNEL_OK")
</pallas_src>

<mosaic_0001>
module attributes {stable_mosaic.version = 11 : i64} {
  func.func @_mha_decov_kernel(%arg0: memref<16x32xf32, #tpu.memory_space<vmem>>, %arg1: memref<16x32xf32, #tpu.memory_space<vmem>>, %arg2: memref<16x32xf32, #tpu.memory_space<vmem>>, %arg3: memref<3x32x32xf32, #tpu.memory_space<vmem>>, %arg4: memref<3x1x32xf32, #tpu.memory_space<vmem>>, %arg5: memref<32x32xf32, #tpu.memory_space<vmem>>, %arg6: memref<1x32xf32, #tpu.memory_space<vmem>>, %arg7: memref<16x32xf32, #tpu.memory_space<vmem>>, %arg8: memref<1x1xf32, #tpu.memory_space<smem>>) attributes {dimension_semantics = [], scalar_prefetch = 0 : i64, scratch_operands = 0 : i64, tpu.core_type = #tpu.core_type<tc>} {
    %c0 = arith.constant 0 : index
    %c0_0 = arith.constant 0 : index
    %0 = vector.load %arg0[%c0, %c0_0] : memref<16x32xf32, #tpu.memory_space<vmem>>, vector<16x32xf32>
    %c0_1 = arith.constant 0 : index
    %c0_2 = arith.constant 0 : index
    %c0_3 = arith.constant 0 : index
    %1 = vector.load %arg3[%c0_1, %c0_2, %c0_3] : memref<3x32x32xf32, #tpu.memory_space<vmem>>, vector<1x32x32xf32>
    %2 = vector.shape_cast %1 : vector<1x32x32xf32> to vector<32x32xf32>
    %cst = arith.constant dense<0.000000e+00> : vector<16x32xf32>
    %3 = tpu.matmul %0, %2, %cst {dimension_numbers = #tpu.dot_dimension_numbers<[1], [0], [0], [1], [0, 0, 1, 1], [], []>} : vector<16x32xf32>, vector<32x32xf32>, vector<16x32xf32> -> vector<16x32xf32>
    %c0_4 = arith.constant 0 : index
    %c0_5 = arith.constant 0 : index
    %c0_6 = arith.constant 0 : index
    %4 = vector.load %arg4[%c0_4, %c0_5, %c0_6] : memref<3x1x32xf32, #tpu.memory_space<vmem>>, vector<1x1x32xf32>
    %5 = vector.shape_cast %4 : vector<1x1x32xf32> to vector<1x32xf32>
    %6 = vector.broadcast %5 : vector<1x32xf32> to vector<16x32xf32>
    %7 = arith.addf %3, %6 : vector<16x32xf32>
    %c0_7 = arith.constant 0 : index
    %c0_8 = arith.constant 0 : index
    %8 = vector.load %arg1[%c0_7, %c0_8] : memref<16x32xf32, #tpu.memory_space<vmem>>, vector<16x32xf32>
    %c1 = arith.constant 1 : index
    %c0_9 = arith.constant 0 : index
    %c0_10 = arith.constant 0 : index
    %9 = vector.load %arg3[%c1, %c0_9, %c0_10] : memref<3x32x32xf32, #tpu.memory_space<vmem>>, vector<1x32x32xf32>
    %10 = vector.shape_cast %9 : vector<1x32x32xf32> to vector<32x32xf32>
    %cst_11 = arith.constant dense<0.000000e+00> : vector<16x32xf32>
    %11 = tpu.matmul %8, %10, %cst_11 {dimension_numbers = #tpu.dot_dimension_numbers<[1], [0], [0], [1], [0, 0, 1, 1], [], []>} : vector<16x32xf32>, vector<32x32xf32>, vector<16x32xf32> -> vector<16x32xf32>
    %c1_12 = arith.constant 1 : index
    %c0_13 = arith.constant 0 : index
    %c0_14 = arith.constant 0 : index
    %12 = vector.load %arg4[%c1_12, %c0_13, %c0_14] : memref<3x1x32xf32, #tpu.memory_space<vmem>>, vector<1x1x32xf32>
    %13 = vector.shape_cast %12 : vector<1x1x32xf32> to vector<1x32xf32>
    %14 = vector.broadcast %13 : vector<1x32xf32> to vector<16x32xf32>
    %15 = arith.addf %11, %14 : vector<16x32xf32>
    %c0_15 = arith.constant 0 : index
    %c0_16 = arith.constant 0 : index
    %16 = vector.load %arg2[%c0_15, %c0_16] : memref<16x32xf32, #tpu.memory_space<vmem>>, vector<16x32xf32>
    %c2 = arith.constant 2 : index
    %c0_17 = arith.constant 0 : index
    %c0_18 = arith.constant 0 : index
    %17 = vector.load %arg3[%c2, %c0_17, %c0_18] : memref<3x32x32xf32, #tpu.memory_space<vmem>>, vector<1x32x32xf32>
    %18 = vector.shape_cast %17 : vector<1x32x32xf32> to vector<32x32xf32>
    %cst_19 = arith.constant dense<0.000000e+00> : vector<16x32xf32>
    %19 = tpu.matmul %16, %18, %cst_19 {dimension_numbers = #tpu.dot_dimension_numbers<[1], [0], [0], [1], [0, 0, 1, 1], [], []>} : vector<16x32xf32>, vector<32x32xf32>, vector<16x32xf32> -> vector<16x32xf32>
    %c2_20 = arith.constant 2 : index
    %c0_21 = arith.constant 0 : index
    %c0_22 = arith.constant 0 : index
    %20 = vector.load %arg4[%c2_20, %c0_21, %c0_22] : memref<3x1x32xf32, #tpu.memory_space<vmem>>, vector<1x1x32xf32>
    %21 = vector.shape_cast %20 : vector<1x1x32xf32> to vector<1x32xf32>
    %22 = vector.broadcast %21 : vector<1x32xf32> to vector<16x32xf32>
    %23 = arith.addf %19, %22 : vector<16x32xf32>
    %24 = vector.shape_cast %7 : vector<16x32xf32> to vector<16x4x8xf32>
    %25 = tpu.transpose %24, [1, 0, 2] : vector<16x4x8xf32> -> vector<4x16x8xf32>
    %26 = vector.shape_cast %25 : vector<4x16x8xf32> to vector<8x8x8xf32>
    %27 = vector.shape_cast %15 : vector<16x32xf32> to vector<16x4x8xf32>
    %28 = tpu.transpose %27, [1, 0, 2] : vector<16x4x8xf32> -> vector<4x16x8xf32>
    %29 = vector.shape_cast %28 : vector<4x16x8xf32> to vector<8x8x8xf32>
    %30 = vector.shape_cast %23 : vector<16x32xf32> to vector<16x4x8xf32>
    %31 = tpu.transpose %30, [1, 0, 2] : vector<16x4x8xf32> -> vector<4x16x8xf32>
    %32 = vector.shape_cast %31 : vector<4x16x8xf32> to vector<8x8x8xf32>
    %cst_23 = arith.constant dense<0.000000e+00> : vector<8x8x8xf32>
    %33 = tpu.matmul %26, %29, %cst_23 {dimension_numbers = #tpu.dot_dimension_numbers<[2], [2], [1], [1], [0, 0, 0, 1, 1, 1], [0], [0]>} : vector<8x8x8xf32>, vector<8x8x8xf32>, vector<8x8x8xf32> -> vector<8x8x8xf32>
    %cst_24 = arith.constant 0.353553385 : f32
    %34 = vector.broadcast %cst_24 : f32 to vector<8x8x8xf32>
    %35 = arith.mulf %33, %34 : vector<8x8x8xf32>
    %cst_25 = arith.constant dense<0xFF800000> : vector<8x8xf32>
    %36 = vector.multi_reduction <maximumf>, %35, %cst_25 [2] : vector<8x8x8xf32> to vector<8x8xf32>
    %37 = vector.shape_cast %36 : vector<8x8xf32> to vector<8x8x1xf32>
    %38 = vector.broadcast %37 : vector<8x8x1xf32> to vector<8x8x8xf32>
    %39 = arith.subf %35, %38 : vector<8x8x8xf32>
    %40 = math.exp %39 : vector<8x8x8xf32>
    %cst_26 = arith.constant dense<0.000000e+00> : vector<8x8xf32>
    %41 = vector.multi_reduction <add>, %40, %cst_26 [2] : vector<8x8x8xf32> to vector<8x8xf32>
    %42 = vector.shape_cast %41 : vector<8x8xf32> to vector<8x8x1xf32>
    %43 = vector.broadcast %42 : vector<8x8x1xf32> to vector<8x8x8xf32>
    %44 = arith.divf %40, %43 : vector<8x8x8xf32>
    %cst_27 = arith.constant dense<0.000000e+00> : vector<8x8x8xf32>
    %45 = tpu.matmul %44, %32, %cst_27 {dimension_numbers = #tpu.dot_dimension_numbers<[2], [1], [1], [2], [0, 0, 0, 1, 1, 2], [0], [0]>} : vector<8x8x8xf32>, vector<8x8x8xf32>, vector<8x8x8xf32> -> vector<8x8x8xf32>
    %46 = vector.shape_cast %45 : vector<8x8x8xf32> to vector<4x16x8xf32>
    %47 = tpu.transpose %46, [1, 0, 2] : vector<4x16x8xf32> -> vector<16x4x8xf32>
    %48 = vector.shape_cast %47 : vector<16x4x8xf32> to vector<16x32xf32>
    %c0_28 = arith.constant 0 : index
    %c0_29 = arith.constant 0 : index
    %49 = vector.load %arg5[%c0_28, %c0_29] : memref<32x32xf32, #tpu.memory_space<vmem>>, vector<32x32xf32>
    %cst_30 = arith.constant dense<0.000000e+00> : vector<16x32xf32>
    %50 = tpu.matmul %48, %49, %cst_30 {dimension_numbers = #tpu.dot_dimension_numbers<[1], [0], [0], [1], [0, 0, 1, 1], [], []>} : vector<16x32xf32>, vector<32x32xf32>, vector<16x32xf32> -> vector<16x32xf32>
    %c0_31 = arith.constant 0 : index
    %c0_32 = arith.constant 0 : index
    %51 = vector.load %arg6[%c0_31, %c0_32] : memref<1x32xf32, #tpu.memory_space<vmem>>, vector<1x32xf32>
    %52 = vector.broadcast %51 : vector<1x32xf32> to vector<16x32xf32>
    %53 = arith.addf %50, %52 : vector<16x32xf32>
    %c0_33 = arith.constant 0 : index
    %c0_34 = arith.constant 0 : index
    %54 = vector.load %arg7[%c0_33, %c0_34] : memref<16x32xf32, #tpu.memory_space<vmem>>, vector<16x32xf32>
    tpu.vector_store %arg7[%c0_33, %c0_34], %53 {strides = array<i32>} : memref<16x32xf32, #tpu.memory_space<vmem>>, vector<16x32xf32>,
    %55 = vector.shape_cast %48 : vector<16x32xf32> to vector<2x8x32xf32>
    %cst_35 = arith.constant dense<0.000000e+00> : vector<8x32xf32>
    %56 = vector.multi_reduction <add>, %55, %cst_35 [0] : vector<2x8x32xf32> to vector<8x32xf32>
    %57 = vector.shape_cast %56 : vector<8x32xf32> to vector<1x8x32xf32>
    %cst_36 = arith.constant 2.000000e+00 : f32
    %58 = vector.broadcast %cst_36 : f32 to vector<1x8x32xf32>
    %59 = arith.divf %57, %58 : vector<1x8x32xf32>
    %60 = vector.broadcast %59 : vector<1x8x32xf32> to vector<2x8x32xf32>
    %61 = arith.subf %55, %60 : vector<2x8x32xf32>
    %62 = tpu.transpose %61, [1, 0, 2] : vector<2x8x32xf32> -> vector<8x2x32xf32>
    %cst_37 = arith.constant dense<0.000000e+00> : vector<8x2x2xf32>
    %63 = tpu.matmul %62, %62, %cst_37 {dimension_numbers = #tpu.dot_dimension_numbers<[2], [2], [1], [1], [0, 0, 0, 1, 1, 1], [0], [0]>} : vector<8x2x32xf32>, vector<8x2x32xf32>, vector<8x2x2xf32> -> vector<8x2x2xf32>
    %64 = arith.mulf %61, %61 : vector<2x8x32xf32>
    %cst_38 = arith.constant dense<0.000000e+00> : vector<8x32xf32>
    %65 = vector.multi_reduction <add>, %64, %cst_38 [0] : vector<2x8x32xf32> to vector<8x32xf32>
    %cst_39 = arith.constant 1.000000e+00 : f32
    %cst_40 = arith.constant 1.000000e+00 : f32
    %66 = arith.divf %cst_39, %cst_40 : f32
    %67 = arith.mulf %63, %63 : vector<8x2x2xf32>
    %68 = vector.shape_cast %67 : vector<8x2x2xf32> to vector<1x8x2x2xf32>
    %cst_41 = arith.constant dense<0.000000e+00> : vector<1xf32>
    %69 = vector.multi_reduction <add>, %68, %cst_41 [1, 2, 3] : vector<1x8x2x2xf32> to vector<1xf32>
    %70 = vector.shape_cast %69 : vector<1xf32> to vector<1x1x1x1xf32>
    %71 = vector.extract %70[0, 0, 0, 0] : f32 from vector<1x1x1x1xf32>
    %72 = arith.mulf %65, %65 : vector<8x32xf32>
    %73 = vector.shape_cast %72 : vector<8x32xf32> to vector<1x8x32xf32>
    %cst_42 = arith.constant dense<0.000000e+00> : vector<1xf32>
    %74 = vector.multi_reduction <add>, %73, %cst_42 [1, 2] : vector<1x8x32xf32> to vector<1xf32>
    %75 = vector.shape_cast %74 : vector<1xf32> to vector<1x1x1xf32>
    %76 = vector.extract %75[0, 0, 0] : f32 from vector<1x1x1xf32>
    %77 = arith.subf %71, %76 : f32
    %cst_43 = arith.constant 5.000000e-01 : f32
    %78 = arith.mulf %cst_43, %77 : f32
    %79 = arith.mulf %78, %66 : f32
    %c0_44 = arith.constant 0 : index
    %c0_45 = arith.constant 0 : index
    %80 = memref.load %arg8[%c0_44, %c0_45] : memref<1x1xf32, #tpu.memory_space<smem>>
    memref.store %79, %arg8[%c0_44, %c0_45] : memref<1x1xf32, #tpu.memory_space<smem>>
    return
  }
}

</mosaic_0001>

<bundles_post_ra>
// kernel: multi_headed_attention.1
= control target key start
LH: loop header
LB: loop body
LE: loop exit
PB: predicated region body
PF: predicated region fallthrough
CT: control target
= control target key end

     0   :  { %14 = vsyncpa [#allocation3], 0  ;;  %vm43_vm0 = vcmask 261120   ;;  %s4639_s0 = inlined_call_operand.vmem [shape: f32[16,32], index: 0, kind: input, shape index: {}]   ;;  %s4640_s1 = inlined_call_operand.vmem [shape: f32[16,32], index: 1, kind: input, shape index: {}]   ;;  %s4641_s2 = inlined_call_operand.vmem [shape: f32[16,32], index: 2, kind: input, shape index: {}]   ;;  %s4642_s3 = inlined_call_operand.vmem [shape: f32[3,32,32], index: 3, kind: input, shape index: {}]   ;;  %s4643_s4 = inlined_call_operand.vmem [shape: f32[3,1,32], index: 4, kind: input, shape index: {}]   ;;  %s4644_s5 = inlined_call_operand.vmem [shape: f32[32,32], index: 5, kind: input, shape index: {}]   ;;  %s4645_s6 = inlined_call_operand.vmem [shape: f32[1,32], index: 6, kind: input, shape index: {}]   ;;  %s4646_s7 = inlined_call_operand.hbm [shape: f32[16,32], index: 7, kind: output, shape index: {0}]   ;;  %s4647_s8 = inlined_call_operand.hbm [shape: f32[1,1], index: 8, kind: output, shape index: {1}]  }
   0x1   :  { %v3622_v0 = vld [vmem:[%s4642_s3 + $0x20] sm:$0xff]  ;;  %v3623_v1 = vld [vmem:[%s4642_s3 + $0x28] sm:$0xff]  ;;  %v3624_v5 = vld [vmem:[%s4642_s3 + $0x30] sm:$0xff] }
   0x2   :  { %v32_v2 = vld [vmem:[%s4642_s3] sm:$0xff]  ;;  %v3941_v3 = vpack.c.bf16 %v3623_v1, %v3622_v0  ;;  %v33_v4 = vld [vmem:[%s4642_s3 + $0x8] sm:$0xff]  ;;  %v3625_v6 = vld [vmem:[%s4642_s3 + $0x38] sm:$0xff] }
   0x3   :  { %v3933_v7 = vpack.c.bf16 %v33_v4, %v32_v2  ;;  %v3945_v8 = vpack.c.bf16 %v3625_v6, %v3624_v5  ;;  %v34_v9 = vld [vmem:[%s4642_s3 + $0x10] sm:$0xff]  ;;  %v35_v10 = vld [vmem:[%s4642_s3 + $0x18] sm:$0xff]  ;;  %v125_v11 = vld [vmem:[%s4640_s1] sm:$0xff] }
   0x4   :  { %3942 = vmatprep.subr.bf16.mxu1 %v3941_v3  ;;  %v3937_v12 = vpack.c.bf16 %v35_v10, %v34_v9  ;;  %3788 = vmatprep.mubr.msk.f32.mxu1 %vm43_vm0, %v125_v11  ;;  %v30_v13 = vld [vmem:[%s4639_s0] sm:$0xff] }
   0x5   :  { %3944 = vmatpush3.bf16.msra.mxu1 %v3941_v3  ;;  %3934 = vmatprep.subr.bf16.mxu0 %v3933_v7 }
   0x6   :  { %15 = vsyncpa [#allocation4], 0  ;;  %3936 = vmatpush3.bf16.msra.mxu0 %v3933_v7  ;;  %3946 = vmatprep.subr.bf16.mxu1 %v3945_v8  ;;  %v126_v14 = vld [vmem:[%s4640_s1 + $0x8] sm:$0xff]  ;;  %v3627_v16 = vld [vmem:[%s4643_s4 + $0x1] ss:$0 sm:$0xff]  ;;  %s4050_s1 = smov 112   ;;  %v342_v37 = vlaneseq }
   0x7   :  { %3938 = vmatprep.subr.bf16.mxu0 %v3937_v12  ;;  %3777 = vmatprep.mubr.msk.f32.mxu0 %vm43_vm0, %v30_v13  ;;  %v31_v15 = vld [vmem:[%s4639_s0 + $0x8] sm:$0xff]  ;;  %v3619_v18 = vld [vmem:[%s4643_s4] ss:$0 sm:$0xff]  ;;  %s4051_s0 = smov 120   ;;  %s4052_s15 = smov 104   ;;  %v3632_v29 = vld [vmem:[%s4642_s3 + $0x50] sm:$0xff] }
   0x8   :  { %v3630_v24 = vld [vmem:[%s4642_s3 + $0x40] sm:$0xff]  ;;  %v3631_v25 = vld [vmem:[%s4642_s3 + $0x48] sm:$0xff]  ;;  %v3633_v30 = vld [vmem:[%s4642_s3 + $0x58] sm:$0xff]  ;;  %v4053_v33 = vmov 0.0   ;;  %vm4054_vm1 = vmmov 0   ;;  %v343_v41 = vshrl.u32 %v342_v37, 7 }
   0x9   :  { %3948 = vmatpush3.bf16.msra.mxu1 %v3945_v8  ;;  %v3949_v26 = vpack.c.bf16 %v3631_v25, %v3630_v24  ;;  %v3953_v31 = vpack.c.bf16 %v3633_v30, %v3632_v29  ;;  %v221_v32 = vld [vmem:[%s4641_s2] sm:$0xff]  ;;  %v222_v34 = vld [vmem:[%s4641_s2 + $0x8] sm:$0xff]  ;;  %v4055_v35 = vmov 1983009808   ;;  %v4056_v38 = vmov 1934713408  }
   0xa   :  { %3940 = vmatpush3.bf16.msra.mxu0 %v3937_v12  ;;  %3802 = vmatprep.subr.mxu1 %v4053_v33  ;;  %v340_v36 = vunpack.c.l.s4 %v4055_v35  ;;  %v372_v39 = vunpack.c.l.s4 %v4056_v38  ;;  %vm1193_vm2 = vcmask 64512   ;;  %s4057_s9 = smov 8   ;;  %s4059_s10 = smov 24   ;;  %vm2780_vm3 = vcmask 130048  }
   0xb   :  { %3950 = vmatprep.subr.bf16.mxu0 %v3949_v26  ;;  %vm2783_vm4 = vcmask 195584   ;;  %vm3550_vm5 = vcmask 9216  }
   0xc   :  { %3789 = vmatmul.mubr.msk.f32.vlgmr.msra.gmra.mrb[0].mxu1 %vm43_vm0, %v126_v14  ;;  %v341_v40 = vunpack.c.0.s8 %v340_v36  ;;  %v373_v44 = vunpack.c.0.s8 %v372_v39 }
   0xd   :  { %3778 = vmatmul.mubr.msk.f32.vlgmr.msra.gmra.mrb[0].mxu0 %vm43_vm0, %v31_v15  ;;  %3804 = vmatprep.mubr.msk.f32.mxu1 %vm4054_vm1, %v4053_v33 }
   0xe   :  { %3952 = vmatpush3.bf16.msra.mxu0 %v3949_v26  ;;  %3799 = vmatprep.mubr.msk.f32.mxu0 %vm43_vm0, %v221_v32  ;;  %v4207_v45 = vsub.s32 %v341_v40, %v343_v41  ;;  %v4211_v52 = vsub.s32 %v373_v44, %v343_v41 }
   0xf   :  { %3954 = vmatprep.subr.bf16.mxu0 %v3953_v31 }
  0x12   :  { %3956 = vmatpush3.bf16.msra.mxu0 %v3953_v31 }
  0x13   :  { %3812 = vmatprep.subr.mxu0 %v4053_v33 }
  0x15   :  { %3800 = vmatmul.mubr.msk.f32.vlgmr.msra.gmra.mrb[2].mxu0 %vm43_vm0, %v222_v34 }
  0x16   :  { %3814 = vmatprep.mubr.msk.f32.mxu0 %vm4054_vm1, %v4053_v33 }
  0xdf   :  { %v3790_v17 = vpop.f32.mrb[0].mxu1 }
  0xe0   :  { %v218_v19 = vadd.f32 %v3790_v17, %v3627_v16  ;;  %v212_v20 = vpop.f32.mrb[1].mxu1  ;;  %v3779_v21 = vpop.f32.mrb[0].mxu0 }
  0xe1   :  { %v116_v22 = vpop.f32.mrb[1].mxu0  ;;  %v4156_v23 = vadd.f32 %v3779_v21, %v3619_v18  ;;  %v4167_v27 = vadd.f32 %v3627_v16, %v212_v20 }
  0xe2   :  { %619 = vrot.lane.b32.xlu1 %v218_v19, %s4050_s1  ;;  %613 = vrot.lane.b32.xlu0 %v218_v19, %s4051_s0  ;;  %v4173_v28 = vadd.f32 %v3619_v18, %v116_v22 }
  0xe6   :  { %625 = vrot.lane.b32.xlu0 %v218_v19, %s4052_s15  ;;  %321 = vrot.lane.b32.xlu1 %v4156_v23, %s4051_s0 }
  0xea   :  { %611 = vrot.lane.b32.xlu0 %v4167_v27, %s4051_s0  ;;  %623 = vrot.lane.b32.xlu1 %v4167_v27, %s4052_s15 }
  0xee   :  { %617 = vrot.lane.b32.xlu0 %v4167_v27, %s4050_s1  ;;  %319 = vrot.lane.b32.xlu1 %v4173_v28, %s4051_s0 }
  0xf2   :  { %325 = vrot.lane.b32.xlu0 %v4173_v28, %s4050_s1  ;;  %331 = vrot.lane.b32.xlu1 %v4173_v28, %s4052_s15 }
  0xf6   :  { %327 = vrot.lane.b32.xlu0 %v4156_v23, %s4050_s1  ;;  %333 = vrot.lane.b32.xlu1 %v4156_v23, %s4052_s15 }
 0x154   :  { %v620_v42 = vpop.permute.xlu1 %619  ;;  %v614_v43 = vpop.permute.xlu0 %613 }
 0x155   :  { %v697_v46 = vcombine.low %v218_v19, %v620_v42  ;;  %v698_v47 = vcombine.high %v218_v19, %v620_v42 }
 0x157   :  { %v705_v53 = vrot.slane %v697_v46, %v4207_v45  ;;  %v712_v54 = vrot.slane %v698_v47, %v4207_v45 }
 0x158   :  { %v626_v48 = vpop.permute.xlu0 %625  ;;  %v4209_v49 = vpop.permute.xlu1 %321 }
 0x159   :  { %v713_v50 = vcombine.low %v614_v43, %v626_v48  ;;  %v714_v51 = vcombine.high %v614_v43, %v626_v48 }
 0x15b   :  { %v721_v55 = vrot.slane %v713_v50, %v4207_v45  ;;  %v728_v56 = vrot.slane %v714_v51, %v4207_v45 }
 0x15c   :  { %v612_v57 = vpop.permute.xlu0 %611  ;;  %v624_v58 = vpop.permute.xlu1 %623 }
 0x15d   :  { %v729_v59 = vcombine.low %v705_v53, %v721_v55  ;;  %v730_v60 = vcombine.high %v705_v53, %v721_v55  ;;  %v745_v61 = vcombine.low %v712_v54, %v728_v56  ;;  %v746_v62 = vcombine.high %v712_v54, %v728_v56 }
 0x15e   :  { %v645_v3 = vcombine.low %v612_v57, %v624_v58  ;;  %v646_v4 = vcombine.high %v612_v57, %v624_v58 }
 0x15f   :  { %v737_v63 = vrot.slane %v729_v59, %v4211_v52  ;;  %v744_v0 = vrot.slane %v730_v60, %v4211_v52  ;;  %v753_v1 = vrot.slane %v745_v61, %v4211_v52  ;;  %v760_v2 = vrot.slane %v746_v62, %v4211_v52 }
 0x160   :  { %v618_v5 = vpop.permute.xlu0 %617  ;;  %v320_v6 = vpop.permute.xlu1 %319  ;;  %v653_v17 = vrot.slane %v645_v3, %v4207_v45  ;;  %v660_v18 = vrot.slane %v646_v4, %v4207_v45 }
 0x161   :  { %v833_v7 = vcombine.low %v737_v63, %v744_v0  ;;  %v3644_v8 = vcombine.high %v737_v63, %v744_v0  ;;  %v849_v9 = vcombine.low %v753_v1, %v760_v2  ;;  %v3645_v10 = vcombine.high %v753_v1, %v760_v2 }
 0x162   :  { %v629_v11 = vcombine.low %v4167_v27, %v618_v5  ;;  %v630_v12 = vcombine.high %v4167_v27, %v618_v5 }
 0x163   :  { %v4224_v13 = vrot.slane %v833_v7, %v4207_v45  ;;  %v4227_v14 = vrot.slane %v3644_v8, %v4207_v45  ;;  %v4230_v15 = vrot.slane %v849_v9, %v4207_v45  ;;  %v4233_v16 = vrot.slane %v3645_v10, %v4207_v45 }
 0x164   :  { %v637_v19 = vrot.slane %v629_v11, %v4207_v45  ;;  %v644_v20 = vrot.slane %v630_v12, %v4207_v45  ;;  %v326_v21 = vpop.permute.xlu0 %325  ;;  %v332_v22 = vpop.permute.xlu1 %331 }
 0x165   :  { %v865_v24 = vcombine.low %v4224_v13, %v4227_v14  ;;  %v881_v25 = vcombine.low %v4230_v15, %v4233_v16  ;;  %v337_v31 = vcombine.low %v4173_v28, %v326_v21  ;;  %v338_v32 = vcombine.high %v4173_v28, %v326_v21 }
 0x166   :  { %v661_v26 = vcombine.low %v637_v19, %v653_v17  ;;  %v662_v27 = vcombine.high %v637_v19, %v653_v17  ;;  %v677_v29 = vcombine.low %v644_v20, %v660_v18  ;;  %v678_v30 = vcombine.high %v644_v20, %v660_v18 }
 0x167   :  { %v353_v34 = vcombine.low %v320_v6, %v332_v22  ;;  %v354_v35 = vcombine.high %v320_v6, %v332_v22  ;;  %v345_v40 = vrot.slane %v337_v31, %v4207_v45  ;;  %v352_v41 = vrot.slane %v338_v32, %v4207_v45 }
 0x168   :  { %v669_v36 = vrot.slane %v661_v26, %v4211_v52  ;;  %v676_v37 = vrot.slane %v662_v27, %v4211_v52  ;;  %v685_v38 = vrot.slane %v677_v29, %v4211_v52  ;;  %v692_v39 = vrot.slane %v678_v30, %v4211_v52  ;;  %v328_v62 = vpop.permute.xlu0 %327  ;;  %v334_v63 = vpop.permute.xlu1 %333 }
 0x169   :  { %v361_v42 = vrot.slane %v353_v34, %v4207_v45  ;;  %v368_v43 = vrot.slane %v354_v35, %v4207_v45  ;;  %v405_v8 = vcombine.low %v4156_v23, %v328_v62  ;;  %v406_v9 = vcombine.high %v4156_v23, %v328_v62 }
 0x16a   :  { %v765_v44 = vcombine.low %v669_v36, %v676_v37  ;;  %v3642_v28 = vcombine.high %v669_v36, %v676_v37  ;;  %v781_v46 = vcombine.low %v685_v38, %v692_v39  ;;  %v3643_v47 = vcombine.high %v685_v38, %v692_v39 }
 0x16b   :  { %v369_v48 = vcombine.low %v345_v40, %v361_v42  ;;  %v370_v50 = vcombine.high %v345_v40, %v361_v42  ;;  %v385_v51 = vcombine.low %v352_v41, %v368_v43  ;;  %v386_v53 = vcombine.high %v352_v41, %v368_v43 }
 0x16c   :  { %v772_v54 = vrot.slane %v765_v44, %v4207_v45  ;;  %v780_v55 = vrot.slane %v3642_v28, %v4207_v45  ;;  %v4256_v56 = vrot.slane %v781_v46, %v4207_v45  ;;  %v4259_v57 = vrot.slane %v3643_v47, %v4207_v45 }
 0x16d   :  { %v377_v58 = vrot.slane %v369_v48, %v4211_v52  ;;  %v384_v59 = vrot.slane %v370_v50, %v4211_v52  ;;  %v393_v60 = vrot.slane %v385_v51, %v4211_v52  ;;  %v400_v61 = vrot.slane %v386_v53, %v4211_v52 }
 0x16e   :  { %v797_v0 = vcombine.low %v772_v54, %v780_v55  ;;  %v798_v1 = vcombine.high %v772_v54, %v780_v55  ;;  %v813_v2 = vcombine.low %v4256_v56, %v4259_v57  ;;  %v814_v3 = vcombine.high %v4256_v56, %v4259_v57 }
 0x16f   :  { %v473_v4 = vcombine.low %v377_v58, %v384_v59  ;;  %v3638_v5 = vcombine.high %v377_v58, %v384_v59  ;;  %v489_v6 = vcombine.low %v393_v60, %v400_v61  ;;  %v3639_v7 = vcombine.high %v393_v60, %v400_v61 }
 0x170   :  { %v421_v10 = vcombine.low %v4209_v49, %v334_v63  ;;  %v422_v11 = vcombine.high %v4209_v49, %v334_v63  ;;  %v413_v20 = vrot.slane %v405_v8, %v4207_v45  ;;  %v420_v21 = vrot.slane %v406_v9, %v4207_v45 }
 0x171   :  { %v480_v12 = vrot.slane %v473_v4, %v4207_v45  ;;  %v488_v17 = vrot.slane %v3638_v5, %v4207_v45  ;;  %v496_v18 = vrot.slane %v489_v6, %v4207_v45  ;;  %v504_v19 = vrot.slane %v3639_v7, %v4207_v45 }
 0x172   :  { %v429_v22 = vrot.slane %v421_v10, %v4207_v45  ;;  %v436_v23 = vrot.slane %v422_v11, %v4207_v45  ;;  %v805_v35 = vrot.slane %v797_v0, %v4211_v52  ;;  %v821_v36 = vrot.slane %v813_v2, %v4211_v52 }
 0x173   :  { %v505_v26 = vcombine.low %v480_v12, %v488_v17  ;;  %v506_v27 = vcombine.high %v480_v12, %v488_v17  ;;  %v521_v29 = vcombine.low %v496_v18, %v504_v19  ;;  %v522_v49 = vcombine.high %v496_v18, %v504_v19 }
 0x174   :  { %v437_v30 = vcombine.low %v413_v20, %v429_v22  ;;  %v438_v31 = vcombine.high %v413_v20, %v429_v22  ;;  %v453_v32 = vcombine.low %v420_v21, %v436_v23  ;;  %v454_v34 = vcombine.high %v420_v21, %v436_v23  ;;  %v3801_v21 = vpop.f32.mrb[2].mxu0 }
 0x175   :  { %v513_v37 = vrot.slane %v505_v26, %v4211_v52  ;;  %v529_v38 = vrot.slane %v521_v29, %v4211_v52  ;;  %v829_v43 = vcombine.low %v805_v35, %v821_v36  ;;  %v830_v44 = vcombine.high %v805_v35, %v821_v36  ;;  %v308_v22 = vpop.f32.mrb[3].mxu0 }
 0x176   :  { %v445_v39 = vrot.slane %v437_v30, %v4211_v52  ;;  %v452_v40 = vrot.slane %v438_v31, %v4211_v52  ;;  %v461_v41 = vrot.slane %v453_v32, %v4211_v52  ;;  %v468_v42 = vrot.slane %v454_v34, %v4211_v52 }
 0x177   :  { %v537_v28 = vcombine.low %v513_v37, %v529_v38  ;;  %v873_v46 = vrot.slane %v865_v24, %v4211_v52  ;;  %3803 = vmatpush3.xpose.msk.msra.mxu1 %vm1193_vm2, %v829_v43  ;;  %3813 = vmatpush3.xpose.msk.msra.mxu0 %vm1193_vm2, %v830_v44  ;;  %v889_v53 = vrot.slane %v881_v25, %v4211_v52 }
 0x178   :  { %v541_v47 = vcombine.low %v445_v39, %v452_v40  ;;  %v3640_v48 = vcombine.high %v445_v39, %v452_v40  ;;  %v557_v50 = vcombine.low %v461_v41, %v468_v42  ;;  %v3641_v51 = vcombine.high %v461_v41, %v468_v42  ;;  %3807 = vmatprep.subr.mxu1 %v4053_v33 }
 0x179   :  { %v538_v54 = vcombine.high %v513_v37, %v529_v38  ;;  %v812_v55 = vrot.slane %v798_v1, %v4211_v52  ;;  %3822 = vmatprep.subr.mxu0 %v4053_v33  ;;  %v897_v59 = vcombine.low %v873_v46, %v889_v53  ;;  %v828_v60 = vrot.slane %v814_v3, %v4211_v52 }
 0x17a   :  { %v548_v56 = vrot.slane %v541_v47, %v4207_v45  ;;  %v556_v24 = vrot.slane %v3640_v48, %v4207_v45  ;;  %v564_v57 = vrot.slane %v557_v50, %v4207_v45  ;;  %v572_v58 = vrot.slane %v3641_v51, %v4207_v45  ;;  %3805 = vmatmul.mubr.msk.f32.vlgmr.msra.gmra.mrb[2].mxu1 %vm1193_vm2, %v537_v28 }
 0x17b   :  { %v866_v25 = vcombine.high %v4224_v13, %v4227_v14  ;;  %v520_v63 = vrot.slane %v506_v27, %v4211_v52  ;;  %v882_v0 = vcombine.high %v4230_v15, %v4233_v16  ;;  %3808 = vmatpush3.xpose.msk.msra.mxu1 %vm1193_vm2, %v897_v59  ;;  %3815 = vmatmul.mubr.msk.f32.vlgmr.msra.gmra.mrb[4].mxu0 %vm1193_vm2, %v538_v54  ;;  %v3635_v59 = vld [vmem:[%s4643_s4 + $0x2] ss:$0 sm:$0xff] }
 0x17c   :  { %v573_v61 = vcombine.low %v548_v56, %v556_v24  ;;  %v589_v62 = vcombine.low %v564_v57, %v572_v58  ;;  %v831_v1 = vcombine.low %v812_v55, %v828_v60  ;;  %v536_v2 = vrot.slane %v522_v49, %v4211_v52  ;;  %3809 = vmatprep.mubr.msk.f32.mxu1 %vm4054_vm1, %v4053_v33 }
 0x17d   :  { %3817 = vmatprep.subr.mxu1 %v4053_v33  ;;  %3824 = vmatprep.mubr.msk.f32.mxu0 %vm4054_vm1, %v4053_v33  ;;  %v574_v15 = vcombine.high %v548_v56, %v556_v24  ;;  %v590_v16 = vcombine.high %v564_v57, %v572_v58  ;;  %v898_v5 = vcombine.high %v873_v46, %v889_v53 }
 0x17e   :  { %v581_v13 = vrot.slane %v573_v61, %v4211_v52  ;;  %v597_v14 = vrot.slane %v589_v62, %v4211_v52  ;;  %3823 = vmatpush3.xpose.msk.msra.mxu0 %vm1193_vm2, %v831_v1  ;;  %v539_v4 = vcombine.low %v520_v63, %v536_v2  ;;  %v832_v6 = vcombine.high %v812_v55, %v828_v60 }
 0x17f   :  { %3832 = vmatprep.subr.mxu0 %v4053_v33  ;;  %v880_v7 = vrot.slane %v866_v25, %v4211_v52  ;;  %v896_v8 = vrot.slane %v882_v0, %v4211_v52  ;;  %v540_v9 = vcombine.high %v520_v63, %v536_v2  ;;  %v588_v11 = vrot.slane %v574_v15, %v4211_v52 }
 0x180   :  { %v605_v3 = vcombine.low %v581_v13, %v597_v14  ;;  %v606_v10 = vcombine.high %v581_v13, %v597_v14  ;;  %v604_v12 = vrot.slane %v590_v16, %v4211_v52  ;;  %v4366_v60 = vadd.f32 %v3635_v59, %v308_v22 }
 0x181   :  { %3825 = vmatmul.mubr.msk.f32.vlgmr.msra.gmra.mrb[6].mxu0 %vm1193_vm2, %v539_v4  ;;  %v899_v17 = vcombine.low %v880_v7, %v896_v8  ;;  %v900_v19 = vcombine.high %v880_v7, %v896_v8  ;;  %v4372_v25 = vadd.f32 %v3801_v21, %v3635_v59 }
 0x182   :  { %3810 = vmatmul.mubr.msk.f32.vlgmr.msra.gmra.mrb[4].mxu1 %vm1193_vm2, %v605_v3  ;;  %3833 = vmatpush3.xpose.msk.msra.mxu0 %vm1193_vm2, %v832_v6  ;;  %v607_v18 = vcombine.low %v588_v11, %v604_v12  ;;  %v608_v20 = vcombine.high %v588_v11, %v604_v12 }
 0x183   :  { %3818 = vmatpush3.xpose.msk.msra.mxu1 %vm1193_vm2, %v898_v5  ;;  %3819 = vmatprep.mubr.msk.f32.mxu1 %vm4054_vm1, %v4053_v33 }
 0x184   :  { %3827 = vmatprep.subr.mxu1 %v4053_v33  ;;  %3834 = vmatprep.mubr.msk.f32.mxu0 %vm4054_vm1, %v4053_v33 }
 0x185   :  { %3842 = vmatprep.subr.mxu0 %v4053_v33  ;;  %3835 = vmatmul.mubr.msk.f32.vlgmr.msra.gmra.mrb[8].mxu0 %vm1193_vm2, %v540_v9 }
 0x186   :  { %3820 = vmatmul.mubr.msk.f32.vlgmr.msra.gmra.mrb[6].mxu1 %vm1193_vm2, %v606_v10  ;;  %3844 = vmatprep.mubr.msk.f32.mxu0 %vm4054_vm1, %v4053_v33 }
 0x187   :  { %3828 = vmatpush3.xpose.msk.msra.mxu1 %vm1193_vm2, %v899_v17  ;;  %3829 = vmatprep.mubr.msk.f32.mxu1 %vm4054_vm1, %v4053_v33 }
 0x188   :  { %3837 = vmatprep.subr.mxu1 %v4053_v33 }
 0x18a   :  { %3830 = vmatmul.mubr.msk.f32.vlgmr.msra.gmra.mrb[8].mxu1 %vm1193_vm2, %v607_v18 }
 0x18b   :  { %3838 = vmatpush3.xpose.msk.msra.mxu1 %vm1193_vm2, %v900_v19  ;;  %3839 = vmatprep.mubr.msk.f32.mxu1 %vm4054_vm1, %v4053_v33 }
 0x18c   :  { %3847 = vmatprep.subr.mxu1 %v4053_v33 }
 0x18e   :  { %3840 = vmatmul.mubr.msk.f32.vlgmr.msra.gmra.mrb[10].mxu1 %vm1193_vm2, %v608_v20 }
 0x18f   :  { %3849 = vmatprep.mubr.msk.f32.mxu1 %vm4054_vm1, %v4053_v33 }
 0x24d   :  { %v1266_v23 = vpop.f32.mrb[2].mxu1 }
 0x24e   :  { %v1802_v26 = vmul.f32 0.35355338, %v1266_v23  ;;  %v1418_v27 = vpop.f32.mrb[4].mxu0  ;;  %v3806_v29 = vpop.f32.mrb[3].mxu1 }
 0x24f   :  { %v3816_v49 = vpop.f32.mrb[5].mxu0  ;;  %v1804_v30 = vmul.f32 0.35355338, %v1418_v27 }
 0x250   :  { %v1810_v31 = vsel %vm1193_vm2, %v1802_v26, -inf }
 0x251   :  { %1811 = vmax.xlane.f32.xlu0 %v1810_v31  ;;  %v1816_v38 = vsel %vm1193_vm2, %v1804_v30, -inf }
 0x254   :  { %v1570_v32 = vpop.f32.mrb[6].mxu0 }
 0x255   :  { %v1342_v34 = vpop.f32.mrb[4].mxu1  ;;  %v3826_v37 = vpop.f32.mrb[7].mxu0  ;;  %1817 = vmax.xlane.f32.xlu0 %v1816_v38  ;;  %v1806_v39 = vmul.f32 0.35355338, %v1570_v32 }
 0x256   :  { %v1803_v35 = vmul.f32 0.35355338, %v1342_v34  ;;  %v3811_v36 = vpop.f32.mrb[5].mxu1 }
 0x257   :  { %v1822_v47 = vsel %vm1193_vm2, %v1806_v39, -inf }
 0x258   :  { %v1813_v40 = vsel %vm1193_vm2, %v1803_v35, -inf  ;;  %v1722_v41 = vpop.f32.mrb[8].mxu0 }
 0x259   :  { %1814 = vmax.xlane.f32.xlu1 %v1813_v40  ;;  %v1494_v42 = vpop.f32.mrb[6].mxu1  ;;  %v3836_v28 = vpop.f32.mrb[9].mxu0  ;;  %v1808_v46 = vmul.f32 0.35355338, %v1722_v41 }
 0x25a   :  { %v1805_v43 = vmul.f32 0.35355338, %v1494_v42  ;;  %v3821_v44 = vpop.f32.mrb[7].mxu1 }
 0x25b   :  { %v1828_v54 = vsel %vm1193_vm2, %v1808_v46, -inf }
 0x25c   :  { %v1819_v48 = vsel %vm1193_vm2, %v1805_v43, -inf }
 0x25d   :  { %1823 = vmax.xlane.f32.xlu1 %v1822_v47  ;;  %1820 = vmax.xlane.f32.xlu0 %v1819_v48  ;;  %v1646_v50 = vpop.f32.mrb[8].mxu1 }
 0x25e   :  { %v1807_v51 = vmul.f32 0.35355338, %v1646_v50  ;;  %v3831_v53 = vpop.f32.mrb[9].mxu1 }
 0x260   :  { %v1825_v55 = vsel %vm1193_vm2, %v1807_v51, -inf }
 0x261   :  { %1829 = vmax.xlane.f32.xlu1 %v1828_v54  ;;  %1826 = vmax.xlane.f32.xlu0 %v1825_v55  ;;  %v1798_v56 = vpop.f32.mrb[10].mxu1 }
 0x262   :  { %v1809_v24 = vmul.f32 0.35355338, %v1798_v56  ;;  %v3841_v57 = vpop.f32.mrb[11].mxu1 }
 0x264   :  { %v1831_v58 = vsel %vm1193_vm2, %v1809_v24, -inf }
 0x265   :  { %1832 = vmax.xlane.f32.xlu0 %v1831_v58 }
 0x272   :  { %903 = vrot.lane.b32.xlu1 %v4366_v60, %s4051_s0 }
 0x276   :  { %909 = vrot.lane.b32.xlu1 %v4366_v60, %s4050_s1 }
 0x27a   :  { %911 = vrot.lane.b32.xlu1 %v4372_v25, %s4050_s1 }
 0x27b   :  { %905 = vrot.lane.b32.xlu0 %v4372_v25, %s4051_s0 }
 0x27e   :  { %917 = vrot.lane.b32.xlu1 %v4372_v25, %s4052_s15 }
 0x27f   :  { %915 = vrot.lane.b32.xlu0 %v4366_v60, %s4052_s15 }
 0x2de   :  { %v1812_v61 = vpop.xlane.xlu0 %1811 }
 0x2df   :  { %v1834_v62 = vsub.f32 %v1802_v26, %v1812_v61 }
 0x2e1   :  { %v1842_v63 = vmul.f32 1.442695, %v1834_v62 }
 0x2e2   :  { %v1818_v0 = vpop.xlane.xlu0 %1817 }
 0x2e3   :  { %3982 = vpow2.f32 %v1842_v63  ;;  %v1836_v1 = vsub.f32 %v1804_v30, %v1818_v0 }
 0x2e5   :  { %v1846_v13 = vmul.f32 1.442695, %v1836_v1 }
 0x2e6   :  { %v1815_v2 = vpop.xlane.xlu1 %1814 }
 0x2e7   :  { %v1835_v14 = vsub.f32 %v1803_v35, %v1815_v2  ;;  %3984 = vpow2.f32 %v1846_v13 }
 0x2e9   :  { %v1844_v15 = vmul.f32 1.442695, %v1835_v14 }
 0x2ea   :  { %v1824_v16 = vpop.xlane.xlu1 %1823  ;;  %v1821_v3 = vpop.xlane.xlu0 %1820 }
 0x2eb   :  { %3986 = vpow2.f32 %v1844_v15  ;;  %v1838_v4 = vsub.f32 %v1806_v39, %v1824_v16  ;;  %v1837_v5 = vsub.f32 %v1805_v43, %v1821_v3 }
 0x2ed   :  { %v1850_v6 = vmul.f32 1.442695, %v1838_v4  ;;  %v1848_v7 = vmul.f32 1.442695, %v1837_v5  ;;  %v4382_v10 = vpop.eup %3982 }
 0x2ee   :  { %v1830_v8 = vpop.xlane.xlu1 %1829  ;;  %v1827_v9 = vpop.xlane.xlu0 %1826  ;;  %v1858_v17 = vsel %vm1193_vm2, %v4382_v10, 0.0 }
 0x2ef   :  { %3988 = vpow2.f32 %v1850_v6  ;;  %v1840_v11 = vsub.f32 %v1808_v46, %v1830_v8  ;;  %v1839_v12 = vsub.f32 %v1807_v51, %v1827_v9  ;;  %1859 = vadd.xlane.f32.xlu1 %v1858_v17 }
 0x2f0   :  { %3990 = vpow2.f32 %v1848_v7 }
 0x2f1   :  { %v1854_v18 = vmul.f32 1.442695, %v1840_v11  ;;  %v1852_v19 = vmul.f32 1.442695, %v1839_v12  ;;  %v4386_v22 = vpop.eup %3984 }
 0x2f2   :  { %v904_v20 = vpop.permute.xlu1 %903  ;;  %v1833_v21 = vpop.xlane.xlu0 %1832  ;;  %v1864_v26 = vsel %vm1193_vm2, %v4386_v22, 0.0 }
 0x2f3   :  { %v1841_v23 = vsub.f32 %v1809_v24, %v1833_v21  ;;  %3992 = vpow2.f32 %v1852_v19  ;;  %1865 = vadd.xlane.f32.xlu1 %v1864_v26 }
 0x2f4   :  { %3994 = vpow2.f32 %v1854_v18 }
 0x2f5   :  { %v4390_v27 = vpop.eup %3986  ;;  %v1856_v29 = vmul.f32 1.442695, %v1841_v23 }
 0x2f6   :  { %v910_v49 = vpop.permute.xlu1 %909  ;;  %v906_v30 = vpop.permute.xlu0 %905  ;;  %v1861_v31 = vsel %vm1193_vm2, %v4390_v27, 0.0 }
 0x2f7   :  { %3996 = vpow2.f32 %v1856_v29  ;;  %1862 = vadd.xlane.f32.xlu0 %v1861_v31  ;;  %v921_v34 = vcombine.low %v4366_v60, %v910_v49  ;;  %v922_v35 = vcombine.high %v4366_v60, %v910_v49 }
 0x2f9   :  { %v4394_v32 = vpop.eup %3988  ;;  %v929_v44 = vrot.slane %v921_v34, %v4207_v45  ;;  %v936_v28 = vrot.slane %v922_v35, %v4207_v45 }
 0x2fa   :  { %v912_v36 = vpop.permute.xlu1 %911  ;;  %v916_v37 = vpop.permute.xlu0 %915  ;;  %v1870_v38 = vsel %vm1193_vm2, %v4394_v32, 0.0 }
 0x2fb   :  { %v4400_v39 = vpop.eup %3990  ;;  %v989_v40 = vcombine.low %v4372_v25, %v912_v36  ;;  %v937_v41 = vcombine.low %v904_v20, %v916_v37  ;;  %v938_v42 = vcombine.high %v904_v20, %v916_v37  ;;  %1871 = vadd.xlane.f32.xlu0 %v1870_v38  ;;  %v990_v43 = vcombine.high %v4372_v25, %v912_v36 }
 0x2fc   :  { %v1867_v53 = vsel %vm1193_vm2, %v4400_v39, 0.0 }
 0x2fd   :  { %v945_v46 = vrot.slane %v937_v41, %v4207_v45  ;;  %v952_v47 = vrot.slane %v938_v42, %v4207_v45  ;;  %v4408_v48 = vpop.eup %3992  ;;  %v997_v50 = vrot.slane %v989_v40, %v4207_v45  ;;  %v1004_v58 = vrot.slane %v990_v43, %v4207_v45 }
 0x2fe   :  { %v918_v51 = vpop.permute.xlu1 %917  ;;  %v4413_v54 = vpop.eup %3994  ;;  %v1873_v25 = vsel %vm1193_vm2, %v4408_v48, 0.0 }
 0x2ff   :  { %v953_v55 = vcombine.low %v929_v44, %v945_v46  ;;  %v954_v56 = vcombine.high %v929_v44, %v945_v46  ;;  %v969_v24 = vcombine.low %v936_v28, %v952_v47  ;;  %v970_v57 = vcombine.high %v936_v28, %v952_v47  ;;  %1868 = vadd.xlane.f32.xlu0 %v1867_v53 }
 0x300   :  { %v1005_v59 = vcombine.low %v906_v30, %v918_v51  ;;  %v1006_v60 = vcombine.high %v906_v30, %v918_v51  ;;  %1874 = vadd.xlane.f32.xlu1 %v1873_v25  ;;  %v1876_v14 = vsel %vm1193_vm2, %v4413_v54, 0.0 }
 0x301   :  { %v4418_v61 = vpop.eup %3996  ;;  %v961_v62 = vrot.slane %v953_v55, %v4211_v52  ;;  %v968_v63 = vrot.slane %v954_v56, %v4211_v52  ;;  %v977_v0 = vrot.slane %v969_v24, %v4211_v52  ;;  %v984_v1 = vrot.slane %v970_v57, %v4211_v52 }
 0x302   :  { %v1013_v2 = vrot.slane %v1005_v59, %v4207_v45  ;;  %v1020_v13 = vrot.slane %v1006_v60, %v4207_v45  ;;  %v1879_v15 = vsel %vm1193_vm2, %v4418_v61, 0.0 }
 0x303   :  { %v1057_v16 = vcombine.low %v961_v62, %v968_v63  ;;  %v3646_v3 = vcombine.high %v961_v62, %v968_v63  ;;  %v1073_v4 = vcombine.low %v977_v0, %v984_v1  ;;  %v3647_v5 = vcombine.high %v977_v0, %v984_v1  ;;  %1877 = vadd.xlane.f32.xlu0 %v1876_v14 }
 0x304   :  { %v1021_v6 = vcombine.low %v997_v50, %v1013_v2  ;;  %v1022_v7 = vcombine.high %v997_v50, %v1013_v2  ;;  %v1037_v8 = vcombine.low %v1004_v58, %v1020_v13  ;;  %v1038_v9 = vcombine.high %v1004_v58, %v1020_v13 }
 0x305   :  { %v1064_v11 = vrot.slane %v1057_v16, %v4207_v45  ;;  %v1072_v12 = vrot.slane %v3646_v3, %v4207_v45  ;;  %v1080_v17 = vrot.slane %v1073_v4, %v4207_v45  ;;  %v1088_v18 = vrot.slane %v3647_v5, %v4207_v45 }
 0x306   :  { %v1029_v19 = vrot.slane %v1021_v6, %v4211_v52  ;;  %v1036_v20 = vrot.slane %v1022_v7, %v4211_v52  ;;  %v1045_v21 = vrot.slane %v1037_v8, %v4211_v52  ;;  %v1052_v23 = vrot.slane %v1038_v9, %v4211_v52 }
 0x307   :  { %1880 = vadd.xlane.f32.xlu0 %v1879_v15  ;;  %v1089_v26 = vcombine.low %v1064_v11, %v1072_v12  ;;  %v1105_v29 = vcombine.low %v1080_v17, %v1088_v18  ;;  %v1090_v49 = vcombine.high %v1064_v11, %v1072_v12  ;;  %v1106_v30 = vcombine.high %v1080_v17, %v1088_v18 }
 0x308   :  { %v1125_v31 = vcombine.low %v1029_v19, %v1036_v20  ;;  %v3648_v34 = vcombine.high %v1029_v19, %v1036_v20  ;;  %v1141_v35 = vcombine.low %v1045_v21, %v1052_v23  ;;  %v3649_v36 = vcombine.high %v1045_v21, %v1052_v23 }
 0x309   :  { %v1097_v37 = vrot.slane %v1089_v26, %v4211_v52  ;;  %v1113_v38 = vrot.slane %v1105_v29, %v4211_v52  ;;  %v4441_v40 = vrot.slane %v1090_v49, %v4211_v52  ;;  %v4444_v41 = vrot.slane %v1106_v30, %v4211_v52 }
 0x30a   :  { %v1132_v42 = vrot.slane %v1125_v31, %v4207_v45  ;;  %v1140_v43 = vrot.slane %v3648_v34, %v4207_v45  ;;  %v1148_v44 = vrot.slane %v1141_v35, %v4207_v45  ;;  %v1156_v28 = vrot.slane %v3649_v36, %v4207_v45 }
 0x30b   :  { %v1121_v46 = vcombine.low %v1097_v37, %v1113_v38  ;;  %v1122_v47 = vcombine.high %v1097_v37, %v1113_v38  ;;  %v1123_v50 = vcombine.low %v4441_v40, %v4444_v41  ;;  %v1124_v51 = vcombine.high %v4441_v40, %v4444_v41 }
 0x30c   :  { %v1157_v53 = vcombine.low %v1132_v42, %v1140_v43  ;;  %v1173_v55 = vcombine.low %v1148_v44, %v1156_v28  ;;  %v1158_v56 = vcombine.high %v1132_v42, %v1140_v43  ;;  %v1174_v24 = vcombine.high %v1148_v44, %v1156_v28 }
 0x30d   :  { %3843 = vmatpush3.msra.mxu0 %v1121_v46 }
 0x30e   :  { %v1165_v57 = vrot.slane %v1157_v53, %v4211_v52  ;;  %v1181_v58 = vrot.slane %v1173_v55, %v4211_v52  ;;  %3852 = vmatprep.subr.mxu0 %v4053_v33  ;;  %v1172_v59 = vrot.slane %v1158_v56, %v4211_v52  ;;  %v1188_v60 = vrot.slane %v1174_v24, %v4211_v52 }
 0x310   :  { %v1189_v25 = vcombine.low %v1165_v57, %v1181_v58  ;;  %v1190_v62 = vcombine.high %v1165_v57, %v1181_v58  ;;  %v1191_v63 = vcombine.low %v1172_v59, %v1188_v60  ;;  %v1192_v0 = vcombine.high %v1172_v59, %v1188_v60 }
 0x312   :  { %3848 = vmatpush3.msra.mxu1 %v1189_v25 }
 0x313   :  { %3857 = vmatprep.subr.mxu1 %v4053_v33 }
 0x37c   :  { %v1860_v1 = vpop.xlane.xlu1 %1859 }
 0x37d   :  { %3998 = vrcp.f32 %v1860_v1 }
 0x380   :  { %v1866_v2 = vpop.xlane.xlu1 %1865 }
 0x381   :  { %4000 = vrcp.f32 %v1866_v2 }
 0x384   :  { %v1863_v13 = vpop.xlane.xlu0 %1862 }
 0x385   :  { %4002 = vrcp.f32 %v1863_v13 }
 0x387   :  { %v3999_v15 = vpop.eup %3998 }
 0x388   :  { %v1872_v14 = vpop.xlane.xlu0 %1871  ;;  %v1883_v16 = vmul.f32 %v3999_v15, %v4382_v10 }
 0x389   :  { %4004 = vrcp.f32 %v1872_v14 }
 0x38a   :  { %3845 = vmatmul.mubr.msk.f32.vlgmr.msra.gmra.mrb[10].mxu0 %vm1193_vm2, %v1883_v16 }
 0x38b   :  { %v4001_v4 = vpop.eup %4000  ;;  %3853 = vmatpush3.msra.mxu0 %v1122_v47  ;;  %3854 = vmatprep.mubr.msk.f32.mxu0 %vm4054_vm1, %v4053_v33 }
 0x38c   :  { %v1869_v3 = vpop.xlane.xlu0 %1868  ;;  %v1887_v5 = vmul.f32 %v4001_v4, %v4386_v22  ;;  %3862 = vmatprep.subr.mxu0 %v4053_v33 }
 0x38d   :  { %4006 = vrcp.f32 %v1869_v3  ;;  %v1875_v6 = vpop.xlane.xlu1 %1874 }
 0x38e   :  { %4008 = vrcp.f32 %v1875_v6  ;;  %3855 = vmatmul.mubr.msk.f32.vlgmr.msra.gmra.mrb[12].mxu0 %vm1193_vm2, %v1887_v5 }
 0x38f   :  { %v4003_v7 = vpop.eup %4002  ;;  %3863 = vmatpush3.msra.mxu0 %v1123_v50  ;;  %3864 = vmatprep.mubr.msk.f32.mxu0 %vm4054_vm1, %v4053_v33 }
 0x390   :  { %v1885_v8 = vmul.f32 %v4003_v7, %v4390_v27  ;;  %v1878_v9 = vpop.xlane.xlu0 %1877  ;;  %3872 = vmatprep.subr.mxu0 %v4053_v33 }
 0x391   :  { %4010 = vrcp.f32 %v1878_v9 }
 0x392   :  { %3850 = vmatmul.mubr.msk.f32.vlgmr.msra.gmra.mrb[12].mxu1 %vm1193_vm2, %v1885_v8 }
 0x393   :  { %v4005_v10 = vpop.eup %4004  ;;  %3858 = vmatpush3.msra.mxu1 %v1190_v62  ;;  %3859 = vmatprep.mubr.msk.f32.mxu1 %vm4054_vm1, %v4053_v33 }
 0x394   :  { %v1891_v22 = vmul.f32 %v4005_v10, %v4394_v32  ;;  %v1881_v27 = vpop.xlane.xlu0 %1880  ;;  %3867 = vmatprep.subr.mxu1 %v4053_v33 }
 0x395   :  { %4012 = vrcp.f32 %v1881_v27 }
 0x396   :  { %3865 = vmatmul.mubr.msk.f32.vlgmr.msra.gmra.mrb[14].mxu0 %vm1193_vm2, %v1891_v22 }
 0x397   :  { %v4007_v11 = vpop.eup %4006  ;;  %3873 = vmatpush3.msra.mxu0 %v1124_v51  ;;  %3874 = vmatprep.mubr.msk.f32.mxu0 %vm4054_vm1, %v4053_v33 }
 0x398   :  { %v1889_v12 = vmul.f32 %v4007_v11, %v4400_v39  ;;  %v4009_v17 = vpop.eup %4008 }
 0x399   :  { %v1893_v32 = vmul.f32 %v4009_v17, %v4408_v48 }
 0x39a   :  { %3860 = vmatmul.mubr.msk.f32.vlgmr.msra.gmra.mrb[14].mxu1 %vm1193_vm2, %v1889_v12 }
 0x39b   :  { %v4011_v18 = vpop.eup %4010  ;;  %3868 = vmatpush3.msra.mxu1 %v1191_v63  ;;  %3869 = vmatprep.mubr.msk.f32.mxu1 %vm4054_vm1, %v4053_v33 }
 0x39c   :  { %v1895_v19 = vmul.f32 %v4011_v18, %v4413_v54  ;;  %3877 = vmatprep.subr.mxu1 %v4053_v33 }
 0x39e   :  { %3870 = vmatmul.mubr.msk.f32.vlgmr.msra.gmra.mrb[16].mxu1 %vm1193_vm2, %v1893_v32  ;;  %3875 = vmatmul.mubr.msk.f32.vlgmr.msra.gmra.mrb[16].mxu0 %vm1193_vm2, %v1895_v19 }
 0x39f   :  { %v4013_v20 = vpop.eup %4012  ;;  %3878 = vmatpush3.msra.mxu1 %v1192_v0  ;;  %3879 = vmatprep.mubr.msk.f32.mxu1 %vm4054_vm1, %v4053_v33 }
 0x3a0   :  { %v1897_v39 = vmul.f32 %v4013_v20, %v4418_v61  ;;  %3893 = vmatprep.subr.mxu1 %v4053_v33 }
 0x3a2   :  { %3880 = vmatmul.mubr.msk.f32.vlgmr.msra.gmra.mrb[18].mxu1 %vm1193_vm2, %v1897_v39 }
 0x3a3   :  { %3895 = vmatprep.mubr.msk.f32.mxu1 %vm4054_vm1, %v4053_v33 }
 0x45d   :  { %v1967_v48 = vpop.f32.mrb[10].mxu0 }
 0x45e   :  { %v3846_v54 = vpop.f32.mrb[11].mxu0 }
 0x461   :  { %v2113_v21 = vpop.f32.mrb[12].mxu0 }
 0x462   :  { %v3856_v23 = vpop.f32.mrb[13].mxu0 }
 0x465   :  { %v2040_v26 = vpop.f32.mrb[12].mxu1 }
 0x466   :  { %v3851_v29 = vpop.f32.mrb[13].mxu1 }
 0x469   :  { %v2259_v49 = vpop.f32.mrb[14].mxu0 }
 0x46a   :  { %v2482_v30 = vcombine.low %v1967_v48, %v2259_v49  ;;  %v2483_v31 = vcombine.high %v1967_v48, %v2259_v49  ;;  %v3866_v34 = vpop.f32.mrb[15].mxu0 }
 0x46c   :  { %v2490_v28 = vrot.slane %v2482_v30, %v4207_v45  ;;  %v2497_v46 = vrot.slane %v2483_v31, %v4207_v45  ;;  %v2786_v30 = vld [vmem:[%s4644_s5] sm:$0xff] }
 0x46d   :  { %v2186_v35 = vpop.f32.mrb[14].mxu1 }
 0x46e   :  { %v3861_v36 = vpop.f32.mrb[15].mxu1 }
 0x471   :  { %v2332_v61 = vpop.f32.mrb[16].mxu1  ;;  %v2405_v37 = vpop.f32.mrb[16].mxu0 }
 0x472   :  { %v2550_v38 = vcombine.low %v2040_v26, %v2332_v61  ;;  %v2551_v40 = vcombine.high %v2040_v26, %v2332_v61  ;;  %v2498_v41 = vcombine.low %v2113_v21, %v2405_v37  ;;  %v2499_v42 = vcombine.high %v2113_v21, %v2405_v37  ;;  %v3871_v43 = vpop.f32.mrb[17].mxu1  ;;  %v3876_v44 = vpop.f32.mrb[17].mxu0  ;;  %v2787_v61 = vld [vmem:[%s4644_s5 + $0x8] sm:$0xff]  ;;  %v2788_v37 = vld [vmem:[%s4644_s5 + $0x10] sm:$0xff] }
 0x474   :  { %v2506_v47 = vrot.slane %v2498_v41, %v4207_v45  ;;  %v2513_v50 = vrot.slane %v2499_v42, %v4207_v45  ;;  %v2558_v0 = vrot.slane %v2550_v38, %v4207_v45  ;;  %v2565_v1 = vrot.slane %v2551_v40, %v4207_v45  ;;  %v2789_v38 = vld [vmem:[%s4644_s5 + $0x18] sm:$0xff]  ;;  %s4058_s5 = smov 16  }
 0x475   :  { %v2478_v51 = vpop.f32.mrb[18].mxu1 }
 0x476   :  { %v2514_v53 = vcombine.low %v2490_v28, %v2506_v47  ;;  %v2515_v55 = vcombine.high %v2490_v28, %v2506_v47  ;;  %v2530_v56 = vcombine.low %v2497_v46, %v2513_v50  ;;  %v2531_v24 = vcombine.high %v2497_v46, %v2513_v50  ;;  %v3881_v57 = vpop.f32.mrb[19].mxu1 }
 0x477   :  { %v2566_v58 = vcombine.low %v2186_v35, %v2478_v51  ;;  %v2567_v59 = vcombine.high %v2186_v35, %v2478_v51  ;;  %v3957_v50 = vpack.c.bf16 %v2787_v61, %v2786_v30  ;;  %v3961_v51 = vpack.c.bf16 %v2789_v38, %v2788_v37  ;;  %v3678_v37 = vld [vmem:[%s4645_s6] ss:$0 sm:$0xff]  ;;  %s4060_s6 = smov [#allocation2]  }
 0x478   :  { %v2522_v60 = vrot.slane %v2514_v53, %v4211_v52  ;;  %v2529_v25 = vrot.slane %v2515_v55, %v4211_v52  ;;  %v2538_v62 = vrot.slane %v2530_v56, %v4211_v52  ;;  %v2545_v63 = vrot.slane %v2531_v24, %v4211_v52  ;;  %s3595_s11 = sshll.u32 %s4060_s6, 4  ;;  %s3596_s11 = int_to_ptr.vmem [resolvable:$true] %s3595_s11 }
 0x479   :  { %v2574_v2 = vrot.slane %v2566_v58, %v4207_v45  ;;  %v2581_v13 = vrot.slane %v2567_v59, %v4207_v45  ;;  %3958 = vmatprep.subr.bf16.mxu0 %v3957_v50  ;;  %s4014_s12 = scalar_lea.vmem %s3596_s11, 256  ;;  %p4019_p1 = scmp.lt.s32.totalorder %s3596_s11, %s3596_s11 }
 0x47a   :  { %v2618_v14 = vcombine.low %v2522_v60, %v2529_v25  ;;  %v3674_v15 = vcombine.high %v2522_v60, %v2529_v25  ;;  %v2634_v16 = vcombine.low %v2538_v62, %v2545_v63  ;;  %v3675_v3 = vcombine.high %v2538_v62, %v2545_v63  ;;  %3960 = vmatpush3.bf16.msra.mxu0 %v3957_v50  ;;  %p4015_p0 = scmp.ne.s32.totalorder %s3596_s11, %s4014_s12  ;;  %p4020_p2 = scmp.lt.s32.totalorder %s4014_s12, %s4014_s12 }
 0x47b   :  { %v2582_v4 = vcombine.low %v2558_v0, %v2574_v2  ;;  %v2583_v5 = vcombine.high %v2558_v0, %v2574_v2  ;;  %v2598_v6 = vcombine.low %v2565_v1, %v2581_v13  ;;  %v2599_v7 = vcombine.high %v2565_v1, %v2581_v13  ;;  %3962 = vmatprep.subr.bf16.mxu0 %v3961_v51 }
 0x47c   :  { %v2625_v8 = vrot.slane %v2618_v14, %v4207_v45  ;;  %v2633_v9 = vrot.slane %v3674_v15, %v4207_v45  ;;  %v2641_v10 = vrot.slane %v2634_v16, %v4207_v45  ;;  %v2649_v22 = vrot.slane %v3675_v3, %v4207_v45  ;;  %p4021_p3 = por %p4020_p2, %p4019_p1 }
 0x47d   :  { %v2590_v27 = vrot.slane %v2582_v4, %v4211_v52  ;;  %v2597_v11 = vrot.slane %v2583_v5, %v4211_v52  ;;  %v2606_v12 = vrot.slane %v2598_v6, %v4211_v52  ;;  %v2613_v17 = vrot.slane %v2599_v7, %v4211_v52 }
 0x47e   :  { %v2650_v18 = vcombine.low %v2625_v8, %v2633_v9  ;;  %v2666_v32 = vcombine.low %v2641_v10, %v2649_v22  ;;  %v2651_v19 = vcombine.high %v2625_v8, %v2633_v9  ;;  %v2667_v20 = vcombine.high %v2641_v10, %v2649_v22  ;;  %3964 = vmatpush3.bf16.msra.mxu0 %v3961_v51  ;;  %p4022_p4 = pnand %p4021_p3, %p4015_p0 }
 0x47f   :  { %v2686_v39 = vcombine.low %v2590_v27, %v2597_v11  ;;  %v3676_v48 = vcombine.high %v2590_v27, %v2597_v11  ;;  %v2702_v54 = vcombine.low %v2606_v12, %v2613_v17  ;;  %v3677_v21 = vcombine.high %v2606_v12, %v2613_v17  ;;  %3903 = vmatprep.subr.mxu0 %v4053_v33 }
 0x480   :  { %v2658_v23 = vrot.slane %v2650_v18, %v4211_v52  ;;  %v2674_v26 = vrot.slane %v2666_v32, %v4211_v52  ;;  %v2665_v29 = vrot.slane %v2651_v19, %v4211_v52  ;;  %v2681_v49 = vrot.slane %v2667_v20, %v4211_v52 }
 0x481   :  { %v2693_v31 = vrot.slane %v2686_v39, %v4207_v45  ;;  %v2701_v34 = vrot.slane %v3676_v48, %v4207_v45  ;;  %v2709_v35 = vrot.slane %v2702_v54, %v4207_v45  ;;  %v2717_v36 = vrot.slane %v3677_v21, %v4207_v45 }
 0x482   :  { %v2683_v40 = vcombine.high %v2658_v23, %v2674_v26  ;;  %v2684_v41 = vcombine.low %v2665_v29, %v2681_v49  ;;  %v2685_v42 = vcombine.high %v2665_v29, %v2681_v49  ;;  %v2682_v43 = vcombine.low %v2658_v23, %v2674_v26 }
 0x483   :  { %v2718_v44 = vcombine.low %v2693_v31, %v2701_v34  ;;  %v2734_v28 = vcombine.low %v2709_v35, %v2717_v36  ;;  %v2719_v46 = vcombine.high %v2693_v31, %v2701_v34  ;;  %v2735_v47 = vcombine.high %v2709_v35, %v2717_v36 }
 0x484   :  { %2756 = vrot.lane.b32.xlu1 %v2683_v40, %s4057_s9 }
 0x485   :  { %v2726_v53 = vrot.slane %v2718_v44, %v4211_v52  ;;  %v2742_v55 = vrot.slane %v2734_v28, %v4211_v52  ;;  %v2733_v56 = vrot.slane %v2719_v46, %v4211_v52  ;;  %v2749_v24 = vrot.slane %v2735_v47, %v4211_v52 }
 0x487   :  { %v2751_v57 = vcombine.high %v2726_v53, %v2742_v55  ;;  %v2752_v58 = vcombine.low %v2733_v56, %v2749_v24  ;;  %v2753_v59 = vcombine.high %v2733_v56, %v2749_v24  ;;  %v2750_v60 = vcombine.low %v2726_v53, %v2742_v55 }
 0x488   :  { %2764 = vrot.lane.b32.xlu1 %v2684_v41, %s4058_s5 }
 0x489   :  { %2758 = vrot.lane.b32.xlu0 %v2751_v57, %s4057_s9 }
 0x48c   :  { %2766 = vrot.lane.b32.xlu1 %v2752_v58, %s4058_s5 }
 0x48d   :  { %2772 = vrot.lane.b32.xlu0 %v2685_v42, %s4059_s10 }
 0x490   :  { %2774 = vrot.lane.b32.xlu1 %v2753_v59, %s4059_s10 }
 0x4f6   :  { %v2757_v25 = vpop.permute.xlu1 %2756 }
 0x4f7   :  { %v2778_v0 = vsel %vm1193_vm2, %v2682_v43, %v2757_v25 }
 0x4fa   :  { %v2765_v62 = vpop.permute.xlu1 %2764 }
 0x4fb   :  { %v2759_v63 = vpop.permute.xlu0 %2758  ;;  %v2781_v2 = vsel %vm2780_vm3, %v2778_v0, %v2765_v62 }
 0x4fc   :  { %v2779_v15 = vsel %vm1193_vm2, %v2750_v60, %v2759_v63 }
 0x4fe   :  { %v2767_v1 = vpop.permute.xlu1 %2766 }
 0x4ff   :  { %v2773_v13 = vpop.permute.xlu0 %2772  ;;  %v2782_v16 = vsel %vm2780_vm3, %v2779_v15, %v2767_v1 }
 0x500   :  { %v2784_v14 = vsel %vm2783_vm4, %v2781_v2, %v2773_v13 }
 0x501   :  { %3890 = vmatprep.mubr.msk.f32.mxu0 %vm43_vm0, %v2784_v14  ;;  %v2880_v5 = vsel %vm43_vm0, %v2784_v14, 0.0 }
 0x502   :  { %v2775_v3 = vpop.permute.xlu1 %2774 }
 0x503   :  { %v2785_v4 = vsel %vm2783_vm4, %v2782_v16, %v2775_v3 }
 0x504   :  { %v2881_v6 = vsel %vm43_vm0, %v2785_v4, 0.0  ;;  %3891 = vmatmul.mubr.msk.f32.vlgmr.msra.gmra.mrb[18].mxu0 %vm43_vm0, %v2785_v4 }
 0x505   :  { %v2882_v7 = vadd.f32 %v2881_v6, %v2880_v5  ;;  %3905 = vmatprep.mubr.msk.f32.mxu0 %vm4054_vm1, %v4053_v33 }
 0x507   :  { %v2884_v8 = vmul.f32 0.5, %v2882_v7 }
 0x509   :  { %v2885_v9 = vsub.f32 %v2784_v14, %v2884_v8  ;;  %v2886_v10 = vsub.f32 %v2785_v4, %v2884_v8 }
 0x50b   :  { %v2887_v22 = vcombine.high %v2885_v9, %v4053_v33  ;;  %v2894_v27 = vrot.slane %v2885_v9, %v4207_v45  ;;  %v2902_v11 = vcombine.high %v2886_v10, %v4053_v33  ;;  %v2909_v12 = vrot.slane %v2886_v10, %v4207_v45 }
 0x50c   :  { %v3537_v17 = vmul.f32 %v2885_v9, %v2885_v9  ;;  %v3538_v18 = vmul.f32 %v2886_v10, %v2886_v10 }
 0x50d   :  { %v2901_v32 = vrot.slane %v2887_v22, %v4207_v45  ;;  %v2916_v19 = vrot.slane %v2902_v11, %v4207_v45  ;;  %v2917_v20 = vcombine.low %v2894_v27, %v2909_v12  ;;  %v2918_v39 = vcombine.high %v2894_v27, %v2909_v12 }
 0x50e   :  { %v3539_v48 = vsel %vm43_vm0, %v3537_v17, 0.0  ;;  %v3540_v54 = vsel %vm43_vm0, %v3538_v18, 0.0 }
 0x50f   :  { %v2933_v21 = vcombine.low %v2901_v32, %v2916_v19  ;;  %v2934_v23 = vcombine.high %v2901_v32, %v2916_v19  ;;  %v2925_v26 = vrot.slane %v2917_v20, %v4211_v52  ;;  %v2932_v29 = vrot.slane %v2918_v39, %v4211_v52 }
 0x510   :  { %v3541_v49 = vadd.f32 %v3540_v54, %v3539_v48 }
 0x511   :  { %3894 = vmatpush3.xpose.msk.msra.mxu1 %vm43_vm0, %v2925_v26  ;;  %3904 = vmatpush3.xpose.msk.msra.mxu0 %vm43_vm0, %v2932_v29  ;;  %v2949_v45 = vcombine.high %v2925_v26, %v4053_v33  ;;  %v2941_v34 = vrot.slane %v2933_v21, %v4211_v52  ;;  %v2950_v35 = vcombine.high %v2932_v29, %v4053_v33 }
 0x512   :  { %v3575_v30 = vmul.f32 %v3541_v49, %v3541_v49  ;;  %3898 = vmatprep.subr.mxu1 %v4053_v33  ;;  %3913 = vmatprep.subr.mxu0 %v4053_v33  ;;  %v2948_v36 = vrot.slane %v2934_v23, %v4211_v52 }
 0x513   :  { %v2951_v61 = vcombine.high %v2941_v34, %v4053_v33 }
 0x514   :  { %v3576_v31 = vsel %vm43_vm0, %v3575_v30, 0.0  ;;  %3896 = vmatmul.mubr.msk.f32.vlgmr.msra.gmra.mrb[20].mxu1 %vm43_vm0, %v2925_v26  ;;  %3906 = vmatmul.mubr.msk.f32.vlgmr.msra.gmra.mrb[20].mxu0 %vm43_vm0, %v2932_v29  ;;  %v2952_v52 = vcombine.high %v2948_v36, %v4053_v33 }
 0x515   :  { %3577 = vadd.xlane.f32.xlu1 %v3576_v31  ;;  %3899 = vmatpush3.xpose.msk.msra.mxu1 %vm43_vm0, %v2949_v45 }
 0x516   :  { %3914 = vmatpush3.xpose.msk.msra.mxu0 %vm43_vm0, %v2941_v34  ;;  %3900 = vmatprep.mubr.msk.f32.mxu1 %vm4054_vm1, %v4053_v33 }
 0x517   :  { %3915 = vmatprep.mubr.msk.f32.mxu0 %vm4054_vm1, %v4053_v33  ;;  %3908 = vmatprep.subr.mxu1 %v4053_v33 }
 0x518   :  { %3901 = vmatmul.mubr.msk.f32.vlgmr.msra.gmra.mrb[22].mxu1 %vm43_vm0, %v2949_v45  ;;  %3923 = vmatprep.subr.mxu0 %v4053_v33 }
 0x519   :  { %3916 = vmatmul.mubr.msk.f32.vlgmr.msra.gmra.mrb[22].mxu0 %vm43_vm0, %v2941_v34  ;;  %3909 = vmatpush3.xpose.msk.msra.mxu1 %vm43_vm0, %v2950_v35 }
 0x51a   :  { %3924 = vmatpush3.xpose.msk.msra.mxu0 %vm43_vm0, %v2948_v36  ;;  %3910 = vmatprep.mubr.msk.f32.mxu1 %vm4054_vm1, %v4053_v33 }
 0x51b   :  { %3925 = vmatprep.mubr.msk.f32.mxu0 %vm4054_vm1, %v4053_v33  ;;  %3918 = vmatprep.subr.mxu1 %v4053_v33 }
 0x51c   :  { %3911 = vmatmul.mubr.msk.f32.vlgmr.msra.gmra.mrb[24].mxu1 %vm43_vm0, %v2950_v35 }
 0x51d   :  { %3926 = vmatmul.mubr.msk.f32.vlgmr.msra.gmra.mrb[24].mxu0 %vm43_vm0, %v2948_v36  ;;  %3919 = vmatpush3.xpose.msk.msra.mxu1 %vm43_vm0, %v2951_v61 }
 0x51e   :  { %3920 = vmatprep.mubr.msk.f32.mxu1 %vm4054_vm1, %v4053_v33  ;;  %3928 = vmatprep.subr.mxu1 %v4053_v33 }
 0x520   :  { %3921 = vmatmul.mubr.msk.f32.vlgmr.msra.gmra.mrb[26].mxu1 %vm43_vm0, %v2951_v61 }
 0x521   :  { %3929 = vmatpush3.xpose.msk.msra.mxu1 %vm43_vm0, %v2952_v52  ;;  %3930 = vmatprep.mubr.msk.f32.mxu1 %vm4054_vm1, %v4053_v33 }
 0x524   :  { %3931 = vmatmul.mubr.msk.f32.vlgmr.msra.gmra.mrb[28].mxu1 %vm43_vm0, %v2952_v52 }
 0x5d7   :  { %v3892_v38 = vpop.f32.mrb[18].mxu0 }
 0x5d8   :  { %v2875_v40 = vadd.f32 %v3892_v38, %v3678_v37  ;;  %v2869_v41 = vpop.f32.mrb[19].mxu0 }
 0x5d9   :  { %v2870_v42 = vadd.f32 %v3678_v37, %v2869_v41 }
 0x5da   :  { %2879 = vst.msk [vmem:[#allocation2 + $0x8] sm:$0xff] %vm43_vm0, %v2875_v40 }
 0x5db   :  { %2878 = vst.msk [vmem:[#allocation2] sm:$0xff] %vm43_vm0, %v2870_v42 }
 0x5e7   :  { %v3022_v43 = vpop.f32.mrb[20].mxu1  ;;  %v3168_v44 = vpop.f32.mrb[20].mxu0 }
 0x5e8   :  { %v3897_v28 = vpop.f32.mrb[21].mxu1  ;;  %v3907_v46 = vpop.f32.mrb[21].mxu0  ;;  %v3542_v47 = vmul.f32 %v3022_v43, %v3022_v43  ;;  %v3544_v50 = vmul.f32 %v3168_v44, %v3168_v44 }
 0x5ea   :  { %v3551_v24 = vsel %vm3550_vm5, %v3542_v47, 0.0  ;;  %v3554_v60 = vsel %vm3550_vm5, %v3544_v50, 0.0 }
 0x5eb   :  { %v3095_v33 = vpop.f32.mrb[22].mxu1 }
 0x5ec   :  { %v3543_v51 = vmul.f32 %v3095_v33, %v3095_v33  ;;  %v3314_v53 = vpop.f32.mrb[22].mxu0  ;;  %v3902_v55 = vpop.f32.mrb[23].mxu1 }
 0x5ed   :  { %v3917_v56 = vpop.f32.mrb[23].mxu0  ;;  %v3546_v25 = vmul.f32 %v3314_v53, %v3314_v53 }
 0x5ee   :  { %v3552_v57 = vsel %vm3550_vm5, %v3543_v51, 0.0 }
 0x5ef   :  { %v3553_v58 = vadd.f32 %v3552_v57, %v3551_v24  ;;  %v3241_v59 = vpop.f32.mrb[24].mxu1  ;;  %v3558_v16 = vsel %vm3550_vm5, %v3546_v25, 0.0 }
 0x5f0   :  { %v3545_v62 = vmul.f32 %v3241_v59, %v3241_v59  ;;  %v3460_v63 = vpop.f32.mrb[24].mxu0  ;;  %v3912_v0 = vpop.f32.mrb[25].mxu1 }
 0x5f1   :  { %v3555_v1 = vadd.f32 %v3554_v60, %v3553_v58  ;;  %v3927_v2 = vpop.f32.mrb[25].mxu0  ;;  %v3548_v3 = vmul.f32 %v3460_v63, %v3460_v63 }
 0x5f2   :  { %v3556_v13 = vsel %vm3550_vm5, %v3545_v62, 0.0 }
 0x5f3   :  { %v3557_v14 = vadd.f32 %v3556_v13, %v3555_v1  ;;  %v3387_v15 = vpop.f32.mrb[26].mxu1  ;;  %v3562_v10 = vsel %vm3550_vm5, %v3548_v3, 0.0 }
 0x5f4   :  { %v3547_v4 = vmul.f32 %v3387_v15, %v3387_v15  ;;  %v3922_v5 = vpop.f32.mrb[27].mxu1 }
 0x5f5   :  { %v3559_v6 = vadd.f32 %v3558_v16, %v3557_v14 }
 0x5f6   :  { %v3560_v7 = vsel %vm3550_vm5, %v3547_v4, 0.0 }
 0x5f7   :  { %v3561_v8 = vadd.f32 %v3560_v7, %v3559_v6  ;;  %v3533_v9 = vpop.f32.mrb[28].mxu1 }
 0x5f8   :  { %v3549_v22 = vmul.f32 %v3533_v9, %v3533_v9  ;;  %v3932_v27 = vpop.f32.mrb[29].mxu1 }
 0x5f9   :  { %v3563_v11 = vadd.f32 %v3562_v10, %v3561_v8 }
 0x5fa   :  { %v3564_v12 = vsel %vm3550_vm5, %v3549_v22, 0.0 }
 0x5fb   :  { %v3565_v17 = vadd.f32 %v3564_v12, %v3563_v11 }
 0x5fd   :  { %3566 = vadd.xlane.f32.xlu0 %v3565_v17 }
 0x5fe   :  { %4025 = shalt.err (!%p4022_p4)
}
 0x5ff   :  { %s4026_s15 = scalar_lea.hbm %s4646_s7, 256 }
 0x600   :  { %p4027_p5 = scmp.ne.s32.totalorder %s4646_s7, %s4026_s15  ;;  %p4030_p6 = scmp.lt.u32.totalorder %s4026_s15, %s4646_s7 }
 0x602   :  { %p4032_p7 = pnand %p4030_p6, %p4027_p5 }
 0x604   :  { %4035 = shalt.err (!%p4032_p7)
}
 0x605   :  { %s4061_s3 = smov 128   ;;  %v3578_v18 = vpop.xlane.xlu1 %3577  ;;  %s4036_s25 = scalar_lea.hbm %s4647_s8, 16 }
 0x606   :  { %3601 = dma.vmem_to_hbm [thread:$0]  %s3596_s11, 256, %s4646_s7, [#allocation3], %s4061_s3, %s4061_s3, %s4057_s9   ;;  %v3579_v32 = vrot.slane %v3578_v18, 4 }
 0x607   :  { %p4037_p8 = scmp.ne.s32.totalorder %s4647_s8, %s4036_s25  ;;  %p4040_p9 = scmp.lt.u32.totalorder %s4036_s25, %s4647_s8 }
 0x608   :  { %v3580_v19 = vadd.f32 %v3579_v32, %v3578_v18 }
 0x609   :  { %p4042_p10 = pnand %p4040_p9, %p4037_p8 }
 0x60a   :  { %v3581_v20 = vrot.slane %v3580_v19, 2 }
 0x60c   :  { %v3582_v21 = vadd.f32 %v3581_v20, %v3580_v19 }
 0x60e   :  { %v3583_v29 = vrot.slane %v3582_v21, 1 }
 0x610   :  { %v3584_v45 = vadd.f32 %v3583_v29, %v3582_v21 }
 0x68a   :  { %v3567_v39 = vpop.xlane.xlu0 %3566 }
 0x68b   :  { %v3568_v48 = vrot.slane %v3567_v39, 4 }
 0x68d   :  { %v3569_v54 = vadd.f32 %v3568_v48, %v3567_v39 }
 0x68f   :  { %v3570_v23 = vrot.slane %v3569_v54, 2 }
 0x691   :  { %v3571_v26 = vadd.f32 %v3570_v23, %v3569_v54 }
 0x693   :  { %v3572_v49 = vrot.slane %v3571_v26, 1 }
 0x695   :  { %v3573_v30 = vadd.f32 %v3572_v49, %v3571_v26 }
 0x697   :  { %3965 = vpush %v3573_v30 }
 0x698   :  { %3967 = vpush %v3584_v45 }
 0x6c8   :  { %s3966_s22 = spop %3965 }
 0x6c9   :  { %s3968_s2 = spop %3967 }
 0x6ca   :  { %s3586_s23 = ssub.f32 %s3966_s22, %s3968_s2 }
 0x6cc   :  { %s3587_s7 = smul.f32 0.5, %s3586_s23 }
 0x6ce   :  { %3589 = sst [smem:[#allocation5]] %s3587_s7 }
 0x6cf   :  { %4045 = shalt.err (!%p4042_p10)
}
 0x6d0   :  { %s4062_s30 = smov [#allocation5]  }
 0x6d1   :  { %3609 = dma.smem_to_hbm %s4062_s30, 16, %s4647_s8, [#allocation4]  }
 0x6d2   :  { %4046 = dma.done.wait [#allocation3], 256  }
 0x6d3   :  { %4047 = vsyncadd [#allocation3], 4294967040 }
 0x6d4   :  { %4048 = dma.done.wait [#allocation4], 16  }
 0x6d5   :  { %4049 = vsyncadd [#allocation4], 4294967280 }
 0x6d6   :  { %3616 = sfence }
 0x6d7   :  { %3617 = vsyncpa [#allocation3], 1 }
 0x6d8   :  { %3618 = vsyncpa [#allocation4], 1 }

</bundles_post_ra>
